<compile_context>
chip_gen: v5e
topology: v5e:2x2
jax: 0.10.0
libtpu: 0.0.40
codegen_flags: <defaults>
</compile_context>

<pallas_src>
import functools
import math

import jax
import jax.numpy as jnp
from jax import lax
from jax.experimental import pallas as pl
from jax.experimental.pallas import tpu as pltpu

LOG_HALF = math.log(0.5)


def _round_up(n, m):
    return ((n + m - 1) // m) * m


def _num_tensorcores():
    """TensorCores per chip (1 on v5e/v6e, 2 on v7x); conservative default 1."""
    try:
        info = pltpu.get_tpu_info()
    except Exception:
        return 1
    for name in ("num_cores", "core_count", "num_tensorcores", "tensorcore_count",
                 "cores_per_chip", "num_tensor_cores"):
        v = getattr(info, name, None)
        if isinstance(v, int) and v >= 1:
            return v
    return 1


def _softplus(x):
    return jnp.maximum(x, 0.0) + jnp.log(1.0 + jnp.exp(-jnp.abs(x)))


# ------------------------------- fused kernel --------------------------------

def fused_lstm_kernel(x_ref, w0_ref, b0_ref, w_ref, b_ref, wo_ref, bo_ref,
                      o_ref, hbuf, *, n_extra_layers):
    """All minLSTM layers + the output Linear for one batch block.

    x_ref : (Bb, T, 1)        scalar input sequence
    w0_ref: (1, NW)   f32     layer-0 fused gate weights [wi|wf|wh], lane-aligned per gate
    b0_ref: (1, NW)   f32     layer-0 fused gate bias
    w_ref : (LW, H, NW) bf16  fused gate weights, layers 1..L-1
    b_ref : (LW, 1, NW) f32   fused gate biases,  layers 1..L-1
    wo_ref: (T*H, NO) bf16    output Linear weight (lane padded)
    bo_ref: (1, NO)   f32     output Linear bias
    o_ref : (Bb, 1, NO)
    hbuf  : (Bb*T, H) f32     VMEM scratch used to flatten h -> (Bb, T*H)
    """
    Bb, T, _ = x_ref.shape
    H = w_ref.shape[1]
    NW = w0_ref.shape[1]
    GP = NW // 3                       # per-gate lane-aligned width (multiple of 128)
    M = Bb * T

    # Triangular ones matrices, generated once and hoisted above the layer loop; kept f32
    # so the log-domain cumsum contractions run at full precision.
    rh = lax.broadcasted_iota(jnp.int32, (H, H), 0)
    ch = lax.broadcasted_iota(jnp.int32, (H, H), 1)
    upper_h = jnp.where(rh <= ch, 1.0, 0.0).astype(jnp.float32)     # hidden-dim cumsum
    rt = lax.broadcasted_iota(jnp.int32, (T, T), 0)
    ct = lax.broadcasted_iota(jnp.int32, (T, T), 1)
    lower_t = jnp.where(rt >= ct, 1.0, 0.0).astype(jnp.float32)     # time-dim cumsum
    lower_bt = jnp.broadcast_to(lower_t[None], (Bb, T, T))
    # TODO(synk): at large T replace the dense (T,T) time-cumsum matmul with a two-level
    # blocked scan (per-block triangle + carried running max/sum), and stream per-layer
    # weights (pl.ANY + make_async_copy, single-buffered invariants) to fit v7x's 64 MiB VMEM.

    def gate_scan(pre):
        """pre: (M, NW) f32 fused gate pre-activation -> h: (Bb, T, H) f32."""
        # One EUP pass over the lane-dense i|f slab; all slices start at a 128-lane tile.
        sp = _softplus(-pre[:, :2 * GP])
        diff = sp[:, GP:GP + H] - sp[:, 0:H]      # softplus(-pre_f) - softplus(-pre_i)
        spd = _softplus(diff)
        log_f = -spd                              # log forget gate
        log_i = diff - spd                        # == -softplus(-diff); one softplus saved
        xh = pre[:, 2 * GP:2 * GP + H]
        # log_g(x) = log(where(x >= 0, x + 0.5, sigmoid(x))); sigmoid via exp + approx recip.
        e = jnp.exp(jnp.minimum(xh, 0.0))
        sig = e * pl.reciprocal(1.0 + e, approx=True)
        log_th = jnp.log(jnp.where(xh >= 0.0, jnp.maximum(xh, 0.0) + 0.5, sig))

        # a_star = cumsum(log_f) over the hidden dim (torch dim=-1, as in the reference),
        # via an f32 MXU contraction against the upper-triangular ones matrix.
        a_star = jnp.dot(log_f, upper_h, preferred_element_type=jnp.float32)   # (M, H)
        v = log_i + log_th - a_star

        # logcumsumexp over time, batched over Bb in one dot_general; the h_0 = 0 row
        # (log_g(0) = log 0.5) is folded in analytically.
        v3 = v.reshape(Bb, T, H)
        a3 = a_star.reshape(Bb, T, H)
        m = jnp.maximum(jnp.max(v3, axis=1, keepdims=True), LOG_HALF)          # (Bb,1,H)
        ev = jnp.exp(v3 - m)
        cs = lax.dot_general(lower_bt, ev, (((2,), (1,)), ((0,), (0,))),
                             preferred_element_type=jnp.float32)               # (Bb,T,H)
        log_h = a3 + m + jnp.log(jnp.exp(LOG_HALF - m) + cs)
        log_h = jnp.minimum(log_h, 60.0)          # exp overflow guard; sigmoid saturates
        # sigmoid(exp(log_h)) via one tanh (EUP) instead of exp + divide
        return 0.5 * jnp.tanh(0.5 * jnp.exp(log_h)) + 0.5

    # ---- layer 0 (dim_in == 1): pre-activation is a pure VPU broadcast, no MXU ----
    xcol = x_ref[...].astype(jnp.float32).reshape(M, 1)
    h3 = gate_scan(xcol * w0_ref[...] + b0_ref[...])                           # (Bb,T,H)

    # ---- layers 1 .. L-1: fused bf16 gate matmul (lane-aligned N) + scan ----
    for l in range(n_extra_layers):
        pre = jnp.dot(h3.reshape(M, H).astype(jnp.bfloat16), w_ref[l],
                      preferred_element_type=jnp.float32) + b_ref[l]           # (M, NW)
        h3 = gate_scan(pre)

    # ---- output Linear(hidden*seq_len -> output): ONE bf16 matmul ----
    # Flatten h (Bb,T,H) -> (Bb, T*H) through VMEM: strided row reads + lane concat.
    hbuf[...] = h3.reshape(M, H)
    hflat = jnp.concatenate(
        [hbuf[pl.ds(t, Bb, stride=T), :] for t in range(T)], axis=-1)          # (Bb, T*H)
    out = jnp.dot(hflat.astype(jnp.bfloat16), wo_ref[...],
                  preferred_element_type=jnp.float32) + bo_ref[...]            # (Bb, NO)
    # Per-row leading-index stores into the lane-padded (unmasked-width) output block.
    for b in range(Bb):
        o_ref[b] = out[b:b + 1, :].astype(o_ref.dtype)


# --------------------------------- wrapper -----------------------------------

def multi_layer_lstm_parallel(x, params):
    """Forward of MultiLayerLSTMParallel. x: (B, seq_len) -> (B, output_size)."""
    layers = params["layers"]
    w_out, b_out = params["w_out"], params["b_out"]
    B, T = x.shape
    H = layers[0][0].shape[1]
    L = len(layers)
    O = w_out.shape[1]
    GP = _round_up(H, 128)            # per-gate lane-aligned width
    NW = 3 * GP                       # fused gate width (multiple of 128)
    NO = _round_up(O, 128)            # lane-padded output width -> unmasked stores
    LW = max(L - 1, 1)

    # Layer 0 (dim_in = 1, from x.unsqueeze(-1)): row-vector gate weights, used in-kernel
    # as a VPU broadcast (no MXU matmul for layer 0).
    wi0, bi0, wf0, bf0, wh0, bh0 = layers[0]
    w0 = jnp.zeros((1, NW), jnp.float32)
    w0 = w0.at[:, 0:H].set(wi0[0:1])
    w0 = w0.at[:, GP:GP + H].set(wf0[0:1])
    w0 = w0.at[:, 2 * GP:2 * GP + H].set(wh0[0:1])
    b0 = jnp.zeros((1, NW), jnp.float32)
    b0 = b0.at[:, 0:H].set(bi0)
    b0 = b0.at[:, GP:GP + H].set(bf0)
    b0 = b0.at[:, 2 * GP:2 * GP + H].set(bh0)

    # Layers 1..L-1: fused, lane-aligned per gate; weights bf16 (MXU), biases f32.
    w_stack = jnp.zeros((LW, H, NW), jnp.float32)
    b_stack = jnp.zeros((LW, 1, NW), jnp.float32)
    for l in range(1, L):
        wi, bi, wf, bf, wh, bh = layers[l]
        j = l - 1
        w_stack = w_stack.at[j, :, 0:H].set(wi)
        w_stack = w_stack.at[j, :, GP:GP + H].set(wf)
        w_stack = w_stack.at[j, :, 2 * GP:2 * GP + H].set(wh)
        b_stack = b_stack.at[j, :, 0:H].set(bi)
        b_stack = b_stack.at[j, :, GP:GP + H].set(bf)
        b_stack = b_stack.at[j, :, 2 * GP:2 * GP + H].set(bh)
    w_stack = w_stack.astype(jnp.bfloat16)

    # Output Linear weight (T*H, O) lane-padded to (T*H, NO); bias (1, NO).
    wo = jnp.zeros((T * H, NO), jnp.float32).at[:, :O].set(w_out).astype(jnp.bfloat16)
    bo = jnp.zeros((1, NO), jnp.float32).at[:, :O].set(b_out)

    # Grid split = TensorCore count (v5e/v6e: 1, v7x: 2), only when each core gets a
    # non-trivial M (>= 64 rows); otherwise a single grid step with the full M = B*T.
    n_cores = _num_tensorcores()
    n_blocks = 1
    if n_cores > 1 and B >= n_cores and (B // n_cores) * T >= 64:
        n_blocks = n_cores
    Bb = -(-B // n_blocks)
    Bp = Bb * n_blocks

    x3 = x.astype(jnp.float32)[:, :, None]                     # (B, T, 1)
    if Bp != B:
        x3 = jnp.concatenate([x3, jnp.zeros((Bp - B, T, 1), jnp.float32)], axis=0)

    kernel = functools.partial(fused_lstm_kernel, n_extra_layers=L - 1)
    out = pl.pallas_call(
        kernel,
        out_shape=jax.ShapeDtypeStruct((Bp, 1, NO), jnp.float32),
        grid=(n_blocks,),
        in_specs=[
            pl.BlockSpec((Bb, T, 1), lambda i: (i, 0, 0)),     # x
            pl.BlockSpec((1, NW), lambda i: (0, 0)),           # layer-0 gate weights
            pl.BlockSpec((1, NW), lambda i: (0, 0)),           # layer-0 gate bias
            pl.BlockSpec((LW, H, NW), lambda i: (0, 0, 0)),    # gate weights, layers 1..L-1
            pl.BlockSpec((LW, 1, NW), lambda i: (0, 0, 0)),    # gate biases
            pl.BlockSpec((T * H, NO), lambda i: (0, 0)),       # output weight
            pl.BlockSpec((1, NO), lambda i: (0, 0)),           # output bias
        ],
        out_specs=pl.BlockSpec((Bb, 1, NO), lambda i: (i, 0, 0)),
        scratch_shapes=[pltpu.VMEM((Bb * T, H), jnp.float32)],
        compiler_params=pltpu.CompilerParams(
            dimension_semantics=("parallel",),
            vmem_limit_bytes=32 * 1024 * 1024,
        ),
    )(x3, w0, b0, w_stack, b_stack, wo, bo)
    return out[:B, 0, :O]


# ------------------------------ parameter init -------------------------------

def init_params(key, input_size, hidden_size, output_size, num_layers, seq_len):
    layers = []
    for i in range(num_layers):
        din = input_size if i == 0 else hidden_size
        bound = 1.0 / math.sqrt(din)
        key, k0, k1, k2, k3, k4, k5 = jax.random.split(key, 7)
        wi = jax.random.uniform(k0, (din, hidden_size), jnp.float32, -bound, bound)
        bi = jax.random.uniform(k1, (1, hidden_size), jnp.float32, -bound, bound)
        wf = jax.random.uniform(k2, (din, hidden_size), jnp.float32, -bound, bound)
        bf = jax.random.uniform(k3, (1, hidden_size), jnp.float32, -bound, bound)
        wh = jax.random.uniform(k4, (din, hidden_size), jnp.float32, -bound, bound)
        bh = jax.random.uniform(k5, (1, hidden_size), jnp.float32, -bound, bound)
        layers.append((wi, bi, wf, bf, wh, bh))

    fan_in = hidden_size * seq_len
    fan_out = output_size
    a = math.sqrt(6.0 / (fan_in + fan_out))       # xavier_uniform
    bb = 1.0 / math.sqrt(fan_in)                  # default Linear bias init
    key, kw, kb = jax.random.split(key, 3)
    w_out = jax.random.uniform(kw, (fan_in, fan_out), jnp.float32, -a, a)
    b_out = jax.random.uniform(kb, (1, fan_out), jnp.float32, -bb, bb)
    return {"layers": layers, "w_out": w_out, "b_out": b_out}


# ----------------------------------- main -------------------------------------

if __name__ == "__main__":
    B, T = 2, 8                     # batch, seq_len
    input_size = 1                  # forward does x.unsqueeze(-1), so features-in = 1
    hidden_size = 32
    output_size = 4
    num_layers = 2

    key = jax.random.PRNGKey(0)
    kp, kx = jax.random.split(key)
    params = init_params(kp, input_size, hidden_size, output_size, num_layers, T)
    x = jax.random.normal(kx, (B, T), jnp.float32)

    fwd = jax.jit(multi_layer_lstm_parallel)
    out = jax.block_until_ready(fwd(x, params))
    assert out.shape == (B, output_size)
    assert bool(jnp.all(jnp.isfinite(out)))
    print("KERNEL_OK")
</pallas_src>

<mosaic_0001>
module attributes {stable_mosaic.version = 11 : i64} {
  func.func @fused_lstm_kernel(%arg0: i32, %arg1: memref<2x8x1xf32, #tpu.memory_space<vmem>>, %arg2: memref<1x384xf32, #tpu.memory_space<vmem>>, %arg3: memref<1x384xf32, #tpu.memory_space<vmem>>, %arg4: memref<1x32x384xbf16, #tpu.memory_space<vmem>>, %arg5: memref<1x1x384xf32, #tpu.memory_space<vmem>>, %arg6: memref<256x128xbf16, #tpu.memory_space<vmem>>, %arg7: memref<1x128xf32, #tpu.memory_space<vmem>>, %arg8: memref<2x1x128xf32, #tpu.memory_space<vmem>>, %arg9: memref<16x32xf32, #tpu.memory_space<vmem>>) attributes {dimension_semantics = [#tpu.dimension_semantics<parallel>], iteration_bounds = array<i64: 1>, scalar_prefetch = 0 : i64, scratch_operands = 1 : i64, tpu.core_type = #tpu.core_type<tc>, window_params = [{transform_indices = @transform_0, window_bounds = array<i64: 2, 8, 1>}, {pipeline_mode = #tpu.pipeline_mode<synchronous>, transform_indices = @transform_1, window_bounds = array<i64: 1, 384>}, {pipeline_mode = #tpu.pipeline_mode<synchronous>, transform_indices = @transform_2, window_bounds = array<i64: 1, 384>}, {pipeline_mode = #tpu.pipeline_mode<synchronous>, transform_indices = @transform_3, window_bounds = array<i64: 1, 32, 384>}, {pipeline_mode = #tpu.pipeline_mode<synchronous>, transform_indices = @transform_4, window_bounds = array<i64: 1, 1, 384>}, {pipeline_mode = #tpu.pipeline_mode<synchronous>, transform_indices = @transform_5, window_bounds = array<i64: 256, 128>}, {pipeline_mode = #tpu.pipeline_mode<synchronous>, transform_indices = @transform_6, window_bounds = array<i64: 1, 128>}, {transform_indices = @transform_7, window_bounds = array<i64: 2, 1, 128>}]} {
    %0 = tpu.iota {dimensions = array<i32: 0>} : vector<32x32xi32>
    %1 = tpu.iota {dimensions = array<i32: 1>} : vector<32x32xi32>
    %2 = arith.cmpi sle, %0, %1 : vector<32x32xi32>
    %cst = arith.constant 1.000000e+00 : f32
    %cst_0 = arith.constant 0.000000e+00 : f32
    %3 = vector.broadcast %cst : f32 to vector<32x32xf32>
    %4 = vector.broadcast %cst_0 : f32 to vector<32x32xf32>
    %5 = arith.select %2, %3, %4 : vector<32x32xi1>, vector<32x32xf32>
    %6 = tpu.iota {dimensions = array<i32: 0>} : vector<8x8xi32>
    %7 = tpu.iota {dimensions = array<i32: 1>} : vector<8x8xi32>
    %8 = arith.cmpi sge, %6, %7 : vector<8x8xi32>
    %cst_1 = arith.constant 1.000000e+00 : f32
    %cst_2 = arith.constant 0.000000e+00 : f32
    %9 = vector.broadcast %cst_1 : f32 to vector<8x8xf32>
    %10 = vector.broadcast %cst_2 : f32 to vector<8x8xf32>
    %11 = arith.select %8, %9, %10 : vector<8x8xi1>, vector<8x8xf32>
    %12 = vector.shape_cast %11 : vector<8x8xf32> to vector<1x8x8xf32>
    %13 = vector.shape_cast %12 : vector<1x8x8xf32> to vector<1x8x8xf32>
    %14 = vector.broadcast %13 : vector<1x8x8xf32> to vector<2x8x8xf32>
    %c0 = arith.constant 0 : index
    %c0_3 = arith.constant 0 : index
    %c0_4 = arith.constant 0 : index
    %15 = vector.load %arg1[%c0, %c0_3, %c0_4] : memref<2x8x1xf32, #tpu.memory_space<vmem>>, vector<2x8x1xf32>
    %16 = vector.shape_cast %15 : vector<2x8x1xf32> to vector<16x1xf32>
    %c0_5 = arith.constant 0 : index
    %c0_6 = arith.constant 0 : index
    %17 = vector.load %arg2[%c0_5, %c0_6] : memref<1x384xf32, #tpu.memory_space<vmem>>, vector<1x384xf32>
    %18 = vector.broadcast %16 : vector<16x1xf32> to vector<16x384xf32>
    %19 = vector.broadcast %17 : vector<1x384xf32> to vector<16x384xf32>
    %20 = arith.mulf %18, %19 : vector<16x384xf32>
    %c0_7 = arith.constant 0 : index
    %c0_8 = arith.constant 0 : index
    %21 = vector.load %arg3[%c0_7, %c0_8] : memref<1x384xf32, #tpu.memory_space<vmem>>, vector<1x384xf32>
    %22 = vector.broadcast %21 : vector<1x384xf32> to vector<16x384xf32>
    %23 = arith.addf %20, %22 : vector<16x384xf32>
    %24 = vector.extract_strided_slice %23 {offsets = [0, 0], sizes = [16, 256], strides = [1, 1]} : vector<16x384xf32> to vector<16x256xf32>
    %cst_9 = arith.constant 0.000000e+00 : f32
    %25 = vector.broadcast %cst_9 : f32 to vector<16x256xf32>
    %26 = arith.subf %25, %24 : vector<16x256xf32>
    %cst_10 = arith.constant 0.000000e+00 : f32
    %27 = vector.broadcast %cst_10 : f32 to vector<16x256xf32>
    %28 = arith.maximumf %26, %27 : vector<16x256xf32>
    %29 = math.absf %26 : vector<16x256xf32>
    %cst_11 = arith.constant 0.000000e+00 : f32
    %30 = vector.broadcast %cst_11 : f32 to vector<16x256xf32>
    %31 = arith.subf %30, %29 : vector<16x256xf32>
    %32 = math.exp %31 : vector<16x256xf32>
    %cst_12 = arith.constant 1.000000e+00 : f32
    %33 = vector.broadcast %cst_12 : f32 to vector<16x256xf32>
    %34 = arith.addf %33, %32 : vector<16x256xf32>
    %35 = math.log %34 : vector<16x256xf32>
    %36 = arith.addf %28, %35 : vector<16x256xf32>
    %37 = vector.extract_strided_slice %36 {offsets = [0, 128], sizes = [16, 32], strides = [1, 1]} : vector<16x256xf32> to vector<16x32xf32>
    %38 = vector.extract_strided_slice %36 {offsets = [0, 0], sizes = [16, 32], strides = [1, 1]} : vector<16x256xf32> to vector<16x32xf32>
    %39 = arith.subf %37, %38 : vector<16x32xf32>
    %cst_13 = arith.constant 0.000000e+00 : f32
    %40 = vector.broadcast %cst_13 : f32 to vector<16x32xf32>
    %41 = arith.maximumf %39, %40 : vector<16x32xf32>
    %42 = math.absf %39 : vector<16x32xf32>
    %cst_14 = arith.constant 0.000000e+00 : f32
    %43 = vector.broadcast %cst_14 : f32 to vector<16x32xf32>
    %44 = arith.subf %43, %42 : vector<16x32xf32>
    %45 = math.exp %44 : vector<16x32xf32>
    %cst_15 = arith.constant 1.000000e+00 : f32
    %46 = vector.broadcast %cst_15 : f32 to vector<16x32xf32>
    %47 = arith.addf %46, %45 : vector<16x32xf32>
    %48 = math.log %47 : vector<16x32xf32>
    %49 = arith.addf %41, %48 : vector<16x32xf32>
    %cst_16 = arith.constant 0.000000e+00 : f32
    %50 = vector.broadcast %cst_16 : f32 to vector<16x32xf32>
    %51 = arith.subf %50, %49 : vector<16x32xf32>
    %52 = arith.subf %39, %49 : vector<16x32xf32>
    %53 = vector.extract_strided_slice %23 {offsets = [0, 256], sizes = [16, 32], strides = [1, 1]} : vector<16x384xf32> to vector<16x32xf32>
    %cst_17 = arith.constant 0.000000e+00 : f32
    %54 = vector.broadcast %cst_17 : f32 to vector<16x32xf32>
    %55 = arith.minimumf %53, %54 : vector<16x32xf32>
    %56 = math.exp %55 : vector<16x32xf32>
    %cst_18 = arith.constant 1.000000e+00 : f32
    %57 = vector.broadcast %cst_18 : f32 to vector<16x32xf32>
    %58 = arith.addf %57, %56 : vector<16x32xf32>
    %59 = tpu.reciprocal %58 {approx = true} : vector<16x32xf32> -> vector<16x32xf32>
    %60 = arith.mulf %56, %59 : vector<16x32xf32>
    %cst_19 = arith.constant 0.000000e+00 : f32
    %61 = vector.broadcast %cst_19 : f32 to vector<16x32xf32>
    %62 = arith.cmpf oge, %53, %61 : vector<16x32xf32>
    %cst_20 = arith.constant 0.000000e+00 : f32
    %63 = vector.broadcast %cst_20 : f32 to vector<16x32xf32>
    %64 = arith.maximumf %53, %63 : vector<16x32xf32>
    %cst_21 = arith.constant 5.000000e-01 : f32
    %65 = vector.broadcast %cst_21 : f32 to vector<16x32xf32>
    %66 = arith.addf %64, %65 : vector<16x32xf32>
    %67 = arith.select %62, %66, %60 : vector<16x32xi1>, vector<16x32xf32>
    %68 = math.log %67 : vector<16x32xf32>
    %cst_22 = arith.constant dense<0.000000e+00> : vector<16x32xf32>
    %69 = tpu.matmul %51, %5, %cst_22 {dimension_numbers = #tpu.dot_dimension_numbers<[1], [0], [0], [1], [0, 0, 1, 1], [], []>} : vector<16x32xf32>, vector<32x32xf32>, vector<16x32xf32> -> vector<16x32xf32>
    %70 = arith.addf %52, %68 : vector<16x32xf32>
    %71 = arith.subf %70, %69 : vector<16x32xf32>
    %72 = vector.shape_cast %71 : vector<16x32xf32> to vector<2x8x32xf32>
    %73 = vector.shape_cast %69 : vector<16x32xf32> to vector<2x8x32xf32>
    %cst_23 = arith.constant dense<0xFF800000> : vector<2x32xf32>
    %74 = vector.multi_reduction <maximumf>, %72, %cst_23 [1] : vector<2x8x32xf32> to vector<2x32xf32>
    %75 = vector.shape_cast %74 : vector<2x32xf32> to vector<2x1x32xf32>
    %cst_24 = arith.constant -0.693147182 : f32
    %76 = vector.broadcast %cst_24 : f32 to vector<2x1x32xf32>
    %77 = arith.maximumf %75, %76 : vector<2x1x32xf32>
    %78 = vector.broadcast %77 : vector<2x1x32xf32> to vector<2x8x32xf32>
    %79 = arith.subf %72, %78 : vector<2x8x32xf32>
    %80 = math.exp %79 : vector<2x8x32xf32>
    %cst_25 = arith.constant dense<0.000000e+00> : vector<2x8x32xf32>
    %81 = tpu.matmul %14, %80, %cst_25 {dimension_numbers = #tpu.dot_dimension_numbers<[2], [1], [1], [2], [0, 0, 0, 1, 1, 2], [0], [0]>} : vector<2x8x8xf32>, vector<2x8x32xf32>, vector<2x8x32xf32> -> vector<2x8x32xf32>
    %82 = vector.broadcast %77 : vector<2x1x32xf32> to vector<2x8x32xf32>
    %83 = arith.addf %73, %82 : vector<2x8x32xf32>
    %cst_26 = arith.constant -0.693147182 : f32
    %84 = vector.broadcast %cst_26 : f32 to vector<2x1x32xf32>
    %85 = arith.subf %84, %77 : vector<2x1x32xf32>
    %86 = math.exp %85 : vector<2x1x32xf32>
    %87 = vector.broadcast %86 : vector<2x1x32xf32> to vector<2x8x32xf32>
    %88 = arith.addf %87, %81 : vector<2x8x32xf32>
    %89 = math.log %88 : vector<2x8x32xf32>
    %90 = arith.addf %83, %89 : vector<2x8x32xf32>
    %cst_27 = arith.constant 6.000000e+01 : f32
    %91 = vector.broadcast %cst_27 : f32 to vector<2x8x32xf32>
    %92 = arith.minimumf %90, %91 : vector<2x8x32xf32>
    %93 = math.exp %92 : vector<2x8x32xf32>
    %cst_28 = arith.constant 5.000000e-01 : f32
    %94 = vector.broadcast %cst_28 : f32 to vector<2x8x32xf32>
    %95 = arith.mulf %94, %93 : vector<2x8x32xf32>
    %96 = math.tanh %95 : vector<2x8x32xf32>
    %cst_29 = arith.constant 5.000000e-01 : f32
    %97 = vector.broadcast %cst_29 : f32 to vector<2x8x32xf32>
    %98 = arith.mulf %97, %96 : vector<2x8x32xf32>
    %cst_30 = arith.constant 5.000000e-01 : f32
    %99 = vector.broadcast %cst_30 : f32 to vector<2x8x32xf32>
    %100 = arith.addf %98, %99 : vector<2x8x32xf32>
    %101 = vector.shape_cast %100 : vector<2x8x32xf32> to vector<16x32xf32>
    %102 = arith.truncf %101 : vector<16x32xf32> to vector<16x32xbf16>
    %c0_31 = arith.constant 0 : index
    %c0_32 = arith.constant 0 : index
    %c0_33 = arith.constant 0 : index
    %103 = vector.load %arg4[%c0_31, %c0_32, %c0_33] : memref<1x32x384xbf16, #tpu.memory_space<vmem>>, vector<1x32x384xbf16>
    %104 = vector.shape_cast %103 : vector<1x32x384xbf16> to vector<32x384xbf16>
    %cst_34 = arith.constant dense<0.000000e+00> : vector<16x384xf32>
    %105 = tpu.matmul %102, %104, %cst_34 {dimension_numbers = #tpu.dot_dimension_numbers<[1], [0], [0], [1], [0, 0, 1, 1], [], []>} : vector<16x32xbf16>, vector<32x384xbf16>, vector<16x384xf32> -> vector<16x384xf32>
    %c0_35 = arith.constant 0 : index
    %c0_36 = arith.constant 0 : index
    %c0_37 = arith.constant 0 : index
    %106 = vector.load %arg5[%c0_35, %c0_36, %c0_37] : memref<1x1x384xf32, #tpu.memory_space<vmem>>, vector<1x1x384xf32>
    %107 = vector.shape_cast %106 : vector<1x1x384xf32> to vector<1x384xf32>
    %108 = vector.broadcast %107 : vector<1x384xf32> to vector<16x384xf32>
    %109 = arith.addf %105, %108 : vector<16x384xf32>
    %110 = vector.extract_strided_slice %109 {offsets = [0, 0], sizes = [16, 256], strides = [1, 1]} : vector<16x384xf32> to vector<16x256xf32>
    %cst_38 = arith.constant 0.000000e+00 : f32
    %111 = vector.broadcast %cst_38 : f32 to vector<16x256xf32>
    %112 = arith.subf %111, %110 : vector<16x256xf32>
    %cst_39 = arith.constant 0.000000e+00 : f32
    %113 = vector.broadcast %cst_39 : f32 to vector<16x256xf32>
    %114 = arith.maximumf %112, %113 : vector<16x256xf32>
    %115 = math.absf %112 : vector<16x256xf32>
    %cst_40 = arith.constant 0.000000e+00 : f32
    %116 = vector.broadcast %cst_40 : f32 to vector<16x256xf32>
    %117 = arith.subf %116, %115 : vector<16x256xf32>
    %118 = math.exp %117 : vector<16x256xf32>
    %cst_41 = arith.constant 1.000000e+00 : f32
    %119 = vector.broadcast %cst_41 : f32 to vector<16x256xf32>
    %120 = arith.addf %119, %118 : vector<16x256xf32>
    %121 = math.log %120 : vector<16x256xf32>
    %122 = arith.addf %114, %121 : vector<16x256xf32>
    %123 = vector.extract_strided_slice %122 {offsets = [0, 128], sizes = [16, 32], strides = [1, 1]} : vector<16x256xf32> to vector<16x32xf32>
    %124 = vector.extract_strided_slice %122 {offsets = [0, 0], sizes = [16, 32], strides = [1, 1]} : vector<16x256xf32> to vector<16x32xf32>
    %125 = arith.subf %123, %124 : vector<16x32xf32>
    %cst_42 = arith.constant 0.000000e+00 : f32
    %126 = vector.broadcast %cst_42 : f32 to vector<16x32xf32>
    %127 = arith.maximumf %125, %126 : vector<16x32xf32>
    %128 = math.absf %125 : vector<16x32xf32>
    %cst_43 = arith.constant 0.000000e+00 : f32
    %129 = vector.broadcast %cst_43 : f32 to vector<16x32xf32>
    %130 = arith.subf %129, %128 : vector<16x32xf32>
    %131 = math.exp %130 : vector<16x32xf32>
    %cst_44 = arith.constant 1.000000e+00 : f32
    %132 = vector.broadcast %cst_44 : f32 to vector<16x32xf32>
    %133 = arith.addf %132, %131 : vector<16x32xf32>
    %134 = math.log %133 : vector<16x32xf32>
    %135 = arith.addf %127, %134 : vector<16x32xf32>
    %cst_45 = arith.constant 0.000000e+00 : f32
    %136 = vector.broadcast %cst_45 : f32 to vector<16x32xf32>
    %137 = arith.subf %136, %135 : vector<16x32xf32>
    %138 = arith.subf %125, %135 : vector<16x32xf32>
    %139 = vector.extract_strided_slice %109 {offsets = [0, 256], sizes = [16, 32], strides = [1, 1]} : vector<16x384xf32> to vector<16x32xf32>
    %cst_46 = arith.constant 0.000000e+00 : f32
    %140 = vector.broadcast %cst_46 : f32 to vector<16x32xf32>
    %141 = arith.minimumf %139, %140 : vector<16x32xf32>
    %142 = math.exp %141 : vector<16x32xf32>
    %cst_47 = arith.constant 1.000000e+00 : f32
    %143 = vector.broadcast %cst_47 : f32 to vector<16x32xf32>
    %144 = arith.addf %143, %142 : vector<16x32xf32>
    %145 = tpu.reciprocal %144 {approx = true} : vector<16x32xf32> -> vector<16x32xf32>
    %146 = arith.mulf %142, %145 : vector<16x32xf32>
    %cst_48 = arith.constant 0.000000e+00 : f32
    %147 = vector.broadcast %cst_48 : f32 to vector<16x32xf32>
    %148 = arith.cmpf oge, %139, %147 : vector<16x32xf32>
    %cst_49 = arith.constant 0.000000e+00 : f32
    %149 = vector.broadcast %cst_49 : f32 to vector<16x32xf32>
    %150 = arith.maximumf %139, %149 : vector<16x32xf32>
    %cst_50 = arith.constant 5.000000e-01 : f32
    %151 = vector.broadcast %cst_50 : f32 to vector<16x32xf32>
    %152 = arith.addf %150, %151 : vector<16x32xf32>
    %153 = arith.select %148, %152, %146 : vector<16x32xi1>, vector<16x32xf32>
    %154 = math.log %153 : vector<16x32xf32>
    %cst_51 = arith.constant dense<0.000000e+00> : vector<16x32xf32>
    %155 = tpu.matmul %137, %5, %cst_51 {dimension_numbers = #tpu.dot_dimension_numbers<[1], [0], [0], [1], [0, 0, 1, 1], [], []>} : vector<16x32xf32>, vector<32x32xf32>, vector<16x32xf32> -> vector<16x32xf32>
    %156 = arith.addf %138, %154 : vector<16x32xf32>
    %157 = arith.subf %156, %155 : vector<16x32xf32>
    %158 = vector.shape_cast %157 : vector<16x32xf32> to vector<2x8x32xf32>
    %159 = vector.shape_cast %155 : vector<16x32xf32> to vector<2x8x32xf32>
    %cst_52 = arith.constant dense<0xFF800000> : vector<2x32xf32>
    %160 = vector.multi_reduction <maximumf>, %158, %cst_52 [1] : vector<2x8x32xf32> to vector<2x32xf32>
    %161 = vector.shape_cast %160 : vector<2x32xf32> to vector<2x1x32xf32>
    %cst_53 = arith.constant -0.693147182 : f32
    %162 = vector.broadcast %cst_53 : f32 to vector<2x1x32xf32>
    %163 = arith.maximumf %161, %162 : vector<2x1x32xf32>
    %164 = vector.broadcast %163 : vector<2x1x32xf32> to vector<2x8x32xf32>
    %165 = arith.subf %158, %164 : vector<2x8x32xf32>
    %166 = math.exp %165 : vector<2x8x32xf32>
    %cst_54 = arith.constant dense<0.000000e+00> : vector<2x8x32xf32>
    %167 = tpu.matmul %14, %166, %cst_54 {dimension_numbers = #tpu.dot_dimension_numbers<[2], [1], [1], [2], [0, 0, 0, 1, 1, 2], [0], [0]>} : vector<2x8x8xf32>, vector<2x8x32xf32>, vector<2x8x32xf32> -> vector<2x8x32xf32>
    %168 = vector.broadcast %163 : vector<2x1x32xf32> to vector<2x8x32xf32>
    %169 = arith.addf %159, %168 : vector<2x8x32xf32>
    %cst_55 = arith.constant -0.693147182 : f32
    %170 = vector.broadcast %cst_55 : f32 to vector<2x1x32xf32>
    %171 = arith.subf %170, %163 : vector<2x1x32xf32>
    %172 = math.exp %171 : vector<2x1x32xf32>
    %173 = vector.broadcast %172 : vector<2x1x32xf32> to vector<2x8x32xf32>
    %174 = arith.addf %173, %167 : vector<2x8x32xf32>
    %175 = math.log %174 : vector<2x8x32xf32>
    %176 = arith.addf %169, %175 : vector<2x8x32xf32>
    %cst_56 = arith.constant 6.000000e+01 : f32
    %177 = vector.broadcast %cst_56 : f32 to vector<2x8x32xf32>
    %178 = arith.minimumf %176, %177 : vector<2x8x32xf32>
    %179 = math.exp %178 : vector<2x8x32xf32>
    %cst_57 = arith.constant 5.000000e-01 : f32
    %180 = vector.broadcast %cst_57 : f32 to vector<2x8x32xf32>
    %181 = arith.mulf %180, %179 : vector<2x8x32xf32>
    %182 = math.tanh %181 : vector<2x8x32xf32>
    %cst_58 = arith.constant 5.000000e-01 : f32
    %183 = vector.broadcast %cst_58 : f32 to vector<2x8x32xf32>
    %184 = arith.mulf %183, %182 : vector<2x8x32xf32>
    %cst_59 = arith.constant 5.000000e-01 : f32
    %185 = vector.broadcast %cst_59 : f32 to vector<2x8x32xf32>
    %186 = arith.addf %184, %185 : vector<2x8x32xf32>
    %187 = vector.shape_cast %186 : vector<2x8x32xf32> to vector<16x32xf32>
    %c0_60 = arith.constant 0 : index
    %c0_61 = arith.constant 0 : index
    %188 = vector.load %arg9[%c0_60, %c0_61] : memref<16x32xf32, #tpu.memory_space<vmem>>, vector<16x32xf32>
    tpu.vector_store %arg9[%c0_60, %c0_61], %187 {strides = array<i32>} : memref<16x32xf32, #tpu.memory_space<vmem>>, vector<16x32xf32>,
    %c0_62 = arith.constant 0 : index
    %c0_63 = arith.constant 0 : index
    %189 = tpu.strided_load %arg9[%c0_62, %c0_63] {strides = array<i32: 8, 1>} : memref<16x32xf32, #tpu.memory_space<vmem>>, vector<2x32xf32>
    %c1 = arith.constant 1 : index
    %c0_64 = arith.constant 0 : index
    %190 = tpu.strided_load %arg9[%c1, %c0_64] {strides = array<i32: 8, 1>} : memref<16x32xf32, #tpu.memory_space<vmem>>, vector<2x32xf32>
    %c2 = arith.constant 2 : index
    %c0_65 = arith.constant 0 : index
    %191 = tpu.strided_load %arg9[%c2, %c0_65] {strides = array<i32: 8, 1>} : memref<16x32xf32, #tpu.memory_space<vmem>>, vector<2x32xf32>
    %c3 = arith.constant 3 : index
    %c0_66 = arith.constant 0 : index
    %192 = tpu.strided_load %arg9[%c3, %c0_66] {strides = array<i32: 8, 1>} : memref<16x32xf32, #tpu.memory_space<vmem>>, vector<2x32xf32>
    %c4 = arith.constant 4 : index
    %c0_67 = arith.constant 0 : index
    %193 = tpu.strided_load %arg9[%c4, %c0_67] {strides = array<i32: 8, 1>} : memref<16x32xf32, #tpu.memory_space<vmem>>, vector<2x32xf32>
    %c5 = arith.constant 5 : index
    %c0_68 = arith.constant 0 : index
    %194 = tpu.strided_load %arg9[%c5, %c0_68] {strides = array<i32: 8, 1>} : memref<16x32xf32, #tpu.memory_space<vmem>>, vector<2x32xf32>
    %c6 = arith.constant 6 : index
    %c0_69 = arith.constant 0 : index
    %195 = tpu.strided_load %arg9[%c6, %c0_69] {strides = array<i32: 8, 1>} : memref<16x32xf32, #tpu.memory_space<vmem>>, vector<2x32xf32>
    %c7 = arith.constant 7 : index
    %c0_70 = arith.constant 0 : index
    %196 = tpu.strided_load %arg9[%c7, %c0_70] {strides = array<i32: 8, 1>} : memref<16x32xf32, #tpu.memory_space<vmem>>, vector<2x32xf32>
    %197 = tpu.concatenate %189, %190, %191, %192, %193, %194, %195, %196 in 1 : vector<2x32xf32>, vector<2x32xf32>, vector<2x32xf32>, vector<2x32xf32>, vector<2x32xf32>, vector<2x32xf32>, vector<2x32xf32>, vector<2x32xf32> -> vector<2x256xf32>
    %198 = arith.truncf %197 : vector<2x256xf32> to vector<2x256xbf16>
    %c0_71 = arith.constant 0 : index
    %c0_72 = arith.constant 0 : index
    %199 = vector.load %arg6[%c0_71, %c0_72] : memref<256x128xbf16, #tpu.memory_space<vmem>>, vector<256x128xbf16>
    %cst_73 = arith.constant dense<0.000000e+00> : vector<2x128xf32>
    %200 = tpu.matmul %198, %199, %cst_73 {dimension_numbers = #tpu.dot_dimension_numbers<[1], [0], [0], [1], [0, 0, 1, 1], [], []>} : vector<2x256xbf16>, vector<256x128xbf16>, vector<2x128xf32> -> vector<2x128xf32>
    %c0_74 = arith.constant 0 : index
    %c0_75 = arith.constant 0 : index
    %201 = vector.load %arg7[%c0_74, %c0_75] : memref<1x128xf32, #tpu.memory_space<vmem>>, vector<1x128xf32>
    %202 = vector.broadcast %201 : vector<1x128xf32> to vector<2x128xf32>
    %203 = arith.addf %200, %202 : vector<2x128xf32>
    %204 = vector.extract_strided_slice %203 {offsets = [0, 0], sizes = [1, 128], strides = [1, 1]} : vector<2x128xf32> to vector<1x128xf32>
    %c0_76 = arith.constant 0 : index
    %c0_77 = arith.constant 0 : index
    %c0_78 = arith.constant 0 : index
    %205 = vector.load %arg8[%c0_76, %c0_77, %c0_78] : memref<2x1x128xf32, #tpu.memory_space<vmem>>, vector<1x1x128xf32>
    %206 = vector.shape_cast %205 : vector<1x1x128xf32> to vector<1x128xf32>
    %207 = vector.shape_cast %204 : vector<1x128xf32> to vector<1x1x128xf32>
    tpu.vector_store %arg8[%c0_76, %c0_77, %c0_78], %207 {strides = array<i32>} : memref<2x1x128xf32, #tpu.memory_space<vmem>>, vector<1x1x128xf32>,
    %208 = vector.extract_strided_slice %203 {offsets = [1, 0], sizes = [1, 128], strides = [1, 1]} : vector<2x128xf32> to vector<1x128xf32>
    %c1_79 = arith.constant 1 : index
    %c0_80 = arith.constant 0 : index
    %c0_81 = arith.constant 0 : index
    %209 = vector.load %arg8[%c1_79, %c0_80, %c0_81] : memref<2x1x128xf32, #tpu.memory_space<vmem>>, vector<1x1x128xf32>
    %210 = vector.shape_cast %209 : vector<1x1x128xf32> to vector<1x128xf32>
    %211 = vector.shape_cast %208 : vector<1x128xf32> to vector<1x1x128xf32>
    tpu.vector_store %arg8[%c1_79, %c0_80, %c0_81], %211 {strides = array<i32>} : memref<2x1x128xf32, #tpu.memory_space<vmem>>, vector<1x1x128xf32>,
    return
  }
  func.func @transform_0(%arg0: i32) -> (i32, i32, i32) {
    %c0_i32 = arith.constant 0 : i32
    %c0_i32_0 = arith.constant 0 : i32
    %c0_i32_1 = arith.constant 0 : i32
    return %arg0, %c0_i32, %c0_i32_0 : i32, i32, i32
  }
  func.func @transform_1(%arg0: i32) -> (i32, i32) {
    %c0_i32 = arith.constant 0 : i32
    %c0_i32_0 = arith.constant 0 : i32
    %c0_i32_1 = arith.constant 0 : i32
    return %c0_i32, %c0_i32_0 : i32, i32
  }
  func.func @transform_2(%arg0: i32) -> (i32, i32) {
    %c0_i32 = arith.constant 0 : i32
    %c0_i32_0 = arith.constant 0 : i32
    %c0_i32_1 = arith.constant 0 : i32
    return %c0_i32, %c0_i32_0 : i32, i32
  }
  func.func @transform_3(%arg0: i32) -> (i32, i32, i32) {
    %c0_i32 = arith.constant 0 : i32
    %c0_i32_0 = arith.constant 0 : i32
    %c0_i32_1 = arith.constant 0 : i32
    %c0_i32_2 = arith.constant 0 : i32
    return %c0_i32, %c0_i32_0, %c0_i32_1 : i32, i32, i32
  }
  func.func @transform_4(%arg0: i32) -> (i32, i32, i32) {
    %c0_i32 = arith.constant 0 : i32
    %c0_i32_0 = arith.constant 0 : i32
    %c0_i32_1 = arith.constant 0 : i32
    %c0_i32_2 = arith.constant 0 : i32
    return %c0_i32, %c0_i32_0, %c0_i32_1 : i32, i32, i32
  }
  func.func @transform_5(%arg0: i32) -> (i32, i32) {
    %c0_i32 = arith.constant 0 : i32
    %c0_i32_0 = arith.constant 0 : i32
    %c0_i32_1 = arith.constant 0 : i32
    return %c0_i32, %c0_i32_0 : i32, i32
  }
  func.func @transform_6(%arg0: i32) -> (i32, i32) {
    %c0_i32 = arith.constant 0 : i32
    %c0_i32_0 = arith.constant 0 : i32
    %c0_i32_1 = arith.constant 0 : i32
    return %c0_i32, %c0_i32_0 : i32, i32
  }
  func.func @transform_7(%arg0: i32) -> (i32, i32, i32) {
    %c0_i32 = arith.constant 0 : i32
    %c0_i32_0 = arith.constant 0 : i32
    %c0_i32_1 = arith.constant 0 : i32
    return %arg0, %c0_i32, %c0_i32_0 : i32, i32, i32
  }
}

</mosaic_0001>

<bundles_post_ra>
// kernel: multi_layer_lstm_parallel.1
= control target key start
LH: loop header
LB: loop body
LE: loop exit
PB: predicated region body
PF: predicated region fallthrough
CT: control target
= control target key end

     0   :  { %v1123_v1 = vmov 0   ;;  %s1361_s0 = inlined_call_operand.vmem [shape: f32[2,8,1], index: 0, kind: input, shape index: {}]   ;;  %s1362_s1 = inlined_call_operand.vmem [shape: f32[1,384], index: 1, kind: input, shape index: {}]   ;;  %s1363_s2 = inlined_call_operand.vmem [shape: f32[1,384], index: 2, kind: input, shape index: {}]   ;;  %s1364_s3 = inlined_call_operand.vmem [shape: bf16[1,32,384], index: 3, kind: input, shape index: {}]   ;;  %s1365_s4 = inlined_call_operand.vmem [shape: f32[1,1,384], index: 4, kind: input, shape index: {}]   ;;  %s1366_s5 = inlined_call_operand.vmem [shape: bf16[256,128], index: 5, kind: input, shape index: {}]   ;;  %s1367_s6 = inlined_call_operand.vmem [shape: f32[1,128], index: 6, kind: input, shape index: {}]   ;;  %s1368_s7 = inlined_call_operand.hbm [shape: f32[2,1,128], index: 7, kind: output, shape index: {}]  }
   0x1   :  { %v45_v0 = vld [vmem:[%s1361_s0] sm:$0xff]  ;;  %978 = vset.pattern.permute.xlu0 %v1123_v1 }
   0x2   :  { %50 = vperm.xlu0 %978, %v45_v0  }
   0x3   :  { %12 = vsyncpa [#allocation4], 0  ;;  %v46_v2 = vld [vmem:[%s1361_s0 + $0x8] sm:$0xff]  ;;  %v47_v3 = vld [vmem:[%s1362_s1] sm:$0x7]  ;;  %v28_v34 = vlaneseq  ;;  %v1124_v49 = vmov 1.0  }
   0x4   :  { %v71_v4 = vld [vmem:[%s1363_s2] sm:$0x7]  ;;  %v59_v5 = vperm.slane %v47_v3, 0  ;;  %v60_v6 = vperm.slane %v47_v3, 1  ;;  %v61_v7 = vperm.slane %v47_v3, 2  ;;  %vm173_vm6 = vcmask 261120  }
   0x5   :  { %v73_v8 = vperm.slane %v71_v4, 0  ;;  %v74_v9 = vperm.slane %v71_v4, 1  ;;  %v75_v10 = vperm.slane %v71_v4, 2  ;;  %v1201_v37 = vshrl.u32 %v28_v34, 7  ;;  %s1127_s8 = smov 32   ;;  %s1128_s0 = smov 64  }
   0x6   :  { %v1206_v42 = vand.u32 127, %v28_v34  ;;  %vm229_vm8 = vcmask 64512   ;;  %vm652_vm11 = vcmask 523264   ;;  %vm654_vm12 = vcmask 785408   ;;  %s1129_s12 = smov [#allocation3]   ;;  %s828_s16 = sshll.u32 %s1368_s7, 4  ;;  %s829_s16 = int_to_ptr.hbm [resolvable:$true] %s828_s16 }
   0x7   :  { %v32_v41 = vadd.s32 24, %v1201_v37  ;;  %v31_v45 = vadd.s32 16, %v1201_v37  ;;  %v30_v46 = vadd.s32 8, %v1201_v37  ;;  %s826_s13 = sshll.u32 %s1129_s12, 4  ;;  %s1130_s17 = smov 16   ;;  %s827_s13 = int_to_ptr.vmem [resolvable:$true] %s826_s13 }
   0x8   :  { %vm35_vm3 = vcmp.le.s32.totalorder %v1201_v37, %v1206_v42  ;;  %vm43_vm7 = vcmp.ge.s32.totalorder %v1201_v37, %v1206_v42  ;;  %s1131_s18 = smov 1  }
   0x9   :  { %vm38_vm0 = vcmp.le.s32.totalorder %v32_v41, %v1206_v42  ;;  %vm37_vm1 = vcmp.le.s32.totalorder %v31_v45, %v1206_v42  ;;  %vm36_vm2 = vcmp.le.s32.totalorder %v30_v46, %v1206_v42 }
   0xa   :  { %55 = vperm.xlu0 %978, %v46_v2   ;;  %840 = vmatpush.msk.msra.mxu3 %vm38_vm0, %v1124_v49 }
   0xb   :  { %875 = vmatpush.msk.msra.mxu0 %vm38_vm0, %v1124_v49 }
   0xc   :  { %841 = vmatpush.msk.msra.mxu3 %vm37_vm1, %v1124_v49 }
   0xd   :  { %876 = vmatpush.msk.msra.mxu0 %vm37_vm1, %v1124_v49 }
   0xe   :  { %842 = vmatpush.msk.msra.mxu3 %vm36_vm2, %v1124_v49 }
   0xf   :  { %877 = vmatpush.msk.msra.mxu0 %vm36_vm2, %v1124_v49 }
  0x10   :  { %843 = vmatpush.msk.msra.mxu3 %vm35_vm3, %v1124_v49 }
  0x11   :  { %878 = vmatpush.msk.msra.mxu0 %vm35_vm3, %v1124_v49 }
  0x74   :  { %v51_v11 = vpop.permute.xlu0 %50 }
  0x75   :  { %v65_v12 = vmul.f32 %v59_v5, %v51_v11  ;;  %v66_v13 = vmul.f32 %v60_v6, %v51_v11  ;;  %v67_v14 = vmul.f32 %v61_v7, %v51_v11 }
  0x77   :  { %v1184_v15 = vadd.f32 %v73_v8, %v65_v12  ;;  %v1186_v16 = vadd.f32 %v74_v9, %v66_v13  ;;  %v1188_v17 = vadd.f32 %v75_v10, %v67_v14 }
  0x79   :  { %v85_v18 = vsub.f32 0.0, %v1184_v15  ;;  %v86_v19 = vsub.f32 0.0, %v1186_v16  ;;  %v149_v32 = vmin.f32 %v1188_v17, 0.0  ;;  %vm161_vm4 = vcmp.ge.f32.partialorder %v1188_v17, 0.0 }
  0x7b   :  { %v93_v20 = vand.u32 2147483647, %v85_v18  ;;  %v94_v21 = vand.u32 2147483647, %v86_v19  ;;  %v151_v40 = vmul.f32 1.442695, %v149_v32 }
  0x7c   :  { %v56_v22 = vpop.permute.xlu0 %55  ;;  %v89_v60 = vmax.f32 %v85_v18, 0.0  ;;  %v90_v63 = vmax.f32 %v86_v19, 0.0 }
  0x7d   :  { %v97_v23 = vsub.f32 0.0, %v93_v20  ;;  %v98_v24 = vsub.f32 0.0, %v94_v21  ;;  %v68_v25 = vmul.f32 %v59_v5, %v56_v22  ;;  %v69_v26 = vmul.f32 %v60_v6, %v56_v22 }
  0x7e   :  { %v70_v27 = vmul.f32 %v61_v7, %v56_v22  ;;  %v163_v22 = vmax.f32 %v1188_v17, 0.0 }
  0x7f   :  { %v101_v28 = vmul.f32 1.442695, %v97_v23  ;;  %v103_v29 = vmul.f32 1.442695, %v98_v24  ;;  %v1192_v30 = vadd.f32 %v73_v8, %v68_v25  ;;  %v1194_v31 = vadd.f32 %v74_v9, %v69_v26 }
  0x80   :  { %v1197_v33 = vadd.f32 %v75_v10, %v70_v27  ;;  %v165_v27 = vadd.f32 0.5, %v163_v22 }
  0x81   :  { %985 = vpow2.f32 %v101_v28  ;;  %v87_v35 = vsub.f32 0.0, %v1192_v30  ;;  %v88_v36 = vsub.f32 0.0, %v1194_v31 }
  0x82   :  { %987 = vpow2.f32 %v103_v29  ;;  %v150_v55 = vmin.f32 %v1197_v33, 0.0  ;;  %v164_v34 = vmax.f32 %v1197_v33, 0.0  ;;  %vm162_vm5 = vcmp.ge.f32.partialorder %v1197_v33, 0.0 }
  0x83   :  { %v95_v38 = vand.u32 2147483647, %v87_v35  ;;  %v96_v39 = vand.u32 2147483647, %v88_v36  ;;  %989 = vpow2.f32 %v151_v40  ;;  %v91_v10 = vmax.f32 %v87_v35, 0.0 }
  0x84   :  { %v153_v1 = vmul.f32 1.442695, %v150_v55  ;;  %v92_v14 = vmax.f32 %v88_v36, 0.0 }
  0x85   :  { %v99_v43 = vsub.f32 0.0, %v95_v38  ;;  %v100_v44 = vsub.f32 0.0, %v96_v39  ;;  %v166_v39 = vadd.f32 0.5, %v164_v34  ;;  %v950_v34 = vld [vmem:[%s1364_s3 + $0x1c] sm:$0xf] }
  0x87   :  { %v986_v47 = vpop.eup %985  ;;  %v105_v48 = vmul.f32 1.442695, %v99_v43  ;;  %v107_v52 = vmul.f32 1.442695, %v100_v44 }
  0x88   :  { %v988_v50 = vpop.eup %987  ;;  %v109_v51 = vadd.f32 1.0, %v986_v47 }
  0x89   :  { %v110_v53 = vadd.f32 1.0, %v988_v50  ;;  %991 = vpow2.f32 %v105_v48  ;;  %v990_v54 = vpop.eup %989 }
  0x8a   :  { %993 = vlog2.f32 %v109_v51  ;;  %v155_v5 = vadd.f32 1.0, %v990_v54 }
  0x8b   :  { %995 = vlog2.f32 %v110_v53 }
  0x8c   :  { %997 = vpow2.f32 %v107_v52 }
  0x8f   :  { %v992_v56 = vpop.eup %991 }
  0x90   :  { %v994_v57 = vpop.eup %993  ;;  %v111_v58 = vadd.f32 1.0, %v992_v56 }
  0x91   :  { %v996_v59 = vpop.eup %995  ;;  %v114_v61 = vmul.f32 0.6931472, %v994_v57 }
  0x92   :  { %v998_v62 = vpop.eup %997  ;;  %v116_v0 = vmul.f32 0.6931472, %v996_v59  ;;  %999 = vlog2.f32 %v111_v58 }
  0x93   :  { %v121_v2 = vadd.f32 %v114_v61, %v89_v60  ;;  %v112_v3 = vadd.f32 1.0, %v998_v62 }
  0x94   :  { %v122_v4 = vadd.f32 %v116_v0, %v90_v63 }
  0x95   :  { %1001 = vlog2.f32 %v112_v3 }
  0x96   :  { %v125_v6 = vsub.f32 %v122_v4, %v121_v2  ;;  %1003 = vpow2.f32 %v153_v1 }
  0x97   :  { %1005 = vrcp.f32 %v155_v5 }
  0x98   :  { %v1000_v7 = vpop.eup %999  ;;  %v129_v8 = vand.u32 2147483647, %v125_v6  ;;  %v127_v40 = vmax.f32 %v125_v6, 0.0 }
  0x99   :  { %v118_v9 = vmul.f32 0.6931472, %v1000_v7 }
  0x9a   :  { %v131_v11 = vsub.f32 0.0, %v129_v8 }
  0x9b   :  { %v1002_v12 = vpop.eup %1001  ;;  %v123_v16 = vadd.f32 %v118_v9, %v91_v10 }
  0x9c   :  { %v1004_v13 = vpop.eup %1003  ;;  %v120_v15 = vmul.f32 0.6931472, %v1002_v12  ;;  %v133_v18 = vmul.f32 1.442695, %v131_v11 }
  0x9d   :  { %v1006_v20 = vpop.eup %1005  ;;  %v156_v21 = vadd.f32 1.0, %v1004_v13 }
  0x9e   :  { %v124_v19 = vadd.f32 %v120_v15, %v92_v14  ;;  %1007 = vpow2.f32 %v133_v18  ;;  %v159_v25 = vmul.f32 %v1006_v20, %v990_v54  ;;  %v1125_v18 = vmov 0.0  }
  0x9f   :  { %1009 = vrcp.f32 %v156_v21 }
  0xa0   :  { %v126_v23 = vsub.f32 %v124_v19, %v123_v16  ;;  %v167_v31 = vsel %vm161_vm4, %v165_v27, %v159_v25  ;;  %v1231_v19 = vsel %vm43_vm7, 1.0, %v1125_v18 }
  0xa2   :  { %v130_v24 = vand.u32 2147483647, %v126_v23  ;;  %v128_v51 = vmax.f32 %v126_v23, 0.0 }
  0xa4   :  { %v1008_v26 = vpop.eup %1007  ;;  %v132_v28 = vsub.f32 0.0, %v130_v24 }
  0xa5   :  { %v137_v29 = vadd.f32 1.0, %v1008_v26  ;;  %v1010_v32 = vpop.eup %1009 }
  0xa6   :  { %v135_v30 = vmul.f32 1.442695, %v132_v28  ;;  %v160_v35 = vmul.f32 %v1010_v32, %v1004_v13  ;;  %v951_v32 = vld [vmem:[%s1364_s3 + $0x20] sm:$0xf0] }
  0xa7   :  { %1011 = vlog2.f32 %v137_v29 }
  0xa8   :  { %1013 = vpow2.f32 %v135_v30  ;;  %v168_v17 = vsel %vm162_vm5, %v166_v39, %v160_v35  ;;  %v850_v39 = vld [vmem:[%s1364_s3] sm:$0xf] }
  0xa9   :  { %1015 = vlog2.f32 %v167_v31  ;;  %v862_v31 = vld [vmem:[%s1364_s3 + $0x18] sm:$0xf] }
  0xad   :  { %v1012_v36 = vpop.eup %1011 }
  0xae   :  { %v1014_v38 = vpop.eup %1013  ;;  %v140_v41 = vmul.f32 0.6931472, %v1012_v36  ;;  %v863_v36 = vor.u32 %v951_v32, %v862_v31 }
  0xaf   :  { %v1016_v43 = vpop.eup %1015  ;;  %v138_v44 = vadd.f32 1.0, %v1014_v38  ;;  %v864_v38 = vld [vmem:[%s1364_s3 + $0x24] sm:$0xf0] }
  0xb0   :  { %v143_v45 = vadd.f32 %v140_v41, %v127_v40  ;;  %v170_v48 = vmul.f32 0.6931472, %v1016_v43  ;;  %v948_v40 = vld [vmem:[%s1364_s3 + $0x8] sm:$0xf0]  ;;  %v867_v41 = vor.u32 %v950_v34, %v864_v38  ;;  %v947_v43 = vld [vmem:[%s1364_s3 + $0x4] sm:$0xf]  ;;  %361 = vmatpush.bf16.msrb.mxu3 %v863_v36 }
  0xb1   :  { %1017 = vlog2.f32 %v138_v44  ;;  %v852_v44 = vld [vmem:[%s1364_s3 + $0xc] sm:$0xf0] }
  0xb2   :  { %v145_v46 = vsub.f32 0.0, %v143_v45  ;;  %v147_v47 = vsub.f32 %v125_v6, %v143_v45  ;;  %1019 = vlog2.f32 %v168_v17  ;;  %v851_v45 = vor.u32 %v948_v40, %v850_v39 }
  0xb3   :  { %v855_v17 = vor.u32 %v947_v43, %v852_v44 }
  0xb4   :  { %844 = vmatmul.msk.f32.vlgmr.msra.gmra.mxu3 %vm173_vm6, %v145_v46  ;;  %v203_v49 = vadd.f32 %v170_v48, %v147_v47 }
  0xb5   :  { %362 = vmatpush.bf16.msrb.mxu3 %v851_v45 }
  0xb7   :  { %v1018_v50 = vpop.eup %1017 }
  0xb8   :  { %v142_v52 = vmul.f32 0.6931472, %v1018_v50  ;;  %v1020_v53 = vpop.eup %1019 }
  0xb9   :  { %v172_v57 = vmul.f32 0.6931472, %v1020_v53  ;;  %v858_v53 = vld [vmem:[%s1364_s3 + $0x8] sm:$0xf] }
  0xba   :  { %v144_v54 = vadd.f32 %v142_v52, %v128_v51  ;;  %v870_v51 = vld [vmem:[%s1364_s3 + $0x20] sm:$0xf]  ;;  %v952_v52 = vld [vmem:[%s1364_s3 + $0x28] sm:$0xf0] }
  0xbc   :  { %v146_v55 = vsub.f32 0.0, %v144_v54  ;;  %v148_v56 = vsub.f32 %v126_v23, %v144_v54 }
  0xbe   :  { %845 = vmatmul.msk.f32.gmra.mxu3 %vm173_vm6, %v146_v55  ;;  %v204_v33 = vadd.f32 %v172_v57, %v148_v56  ;;  %v871_v55 = vor.u32 %v952_v52, %v870_v51  ;;  %v949_v56 = vld [vmem:[%s1364_s3 + $0x10] sm:$0xf0] }
 0x137   :  { %v197_v58 = vpop.f32.mrf.mxu3 }
 0x138   :  { %v205_v59 = vsub.f32 %v203_v49, %v197_v58 }
 0x13a   :  { %v207_v60 = vsel %vm173_vm6, %v205_v59, -inf }
 0x13b   :  { %v208_v61 = vrot.slane %v207_v60, 4 }
 0x13d   :  { %v209_v62 = vmax.f32 %v207_v60, %v208_v61 }
 0x13f   :  { %v210_v63 = vrot.slane %v209_v62, 2 }
 0x141   :  { %v211_v0 = vmax.f32 %v209_v62, %v210_v63  ;;  %v1225_v1 = vpop.f32.mrf.mxu3 }
 0x142   :  { %v206_v2 = vsub.f32 %v204_v33, %v1225_v1 }
 0x143   :  { %v212_v3 = vrot.slane %v211_v0, 1 }
 0x144   :  { %v214_v4 = vsel %vm173_vm6, %v206_v2, -inf }
 0x145   :  { %v213_v5 = vmax.f32 %v211_v0, %v212_v3  ;;  %v215_v6 = vrot.slane %v214_v4, 4 }
 0x147   :  { %v221_v7 = vmax.f32 %v213_v5, -0.6931472  ;;  %v216_v8 = vmax.f32 %v214_v4, %v215_v6 }
 0x149   :  { %v273_v9 = vadd.f32 %v221_v7, %v197_v58  ;;  %v217_v10 = vrot.slane %v216_v8, 2  ;;  %v223_v11 = vsub.f32 %v205_v59, %v221_v7  ;;  %v275_v24 = vsub.f32 -0.6931472, %v221_v7 }
 0x14a   :  { %v859_v58 = vor.u32 %v949_v56, %v858_v53 }
 0x14b   :  { %v218_v12 = vmax.f32 %v216_v8, %v217_v10  ;;  %v225_v13 = vmul.f32 1.442695, %v223_v11  ;;  %v277_v37 = vmul.f32 1.442695, %v275_v24 }
 0x14d   :  { %v219_v14 = vrot.slane %v218_v12, 1  ;;  %1021 = vpow2.f32 %v225_v13 }
 0x14f   :  { %v220_v15 = vmax.f32 %v218_v12, %v219_v14 }
 0x151   :  { %v222_v16 = vmax.f32 %v220_v15, -0.6931472 }
 0x153   :  { %v1022_v20 = vpop.eup %1021  ;;  %v224_v21 = vsub.f32 %v206_v2, %v222_v16  ;;  %v276_v27 = vsub.f32 -0.6931472, %v222_v16  ;;  %v274_v57 = vadd.f32 %v222_v16, %v1225_v1 }
 0x154   :  { %248 = vmatpush.msra.mxu1 %v1022_v20 }
 0x155   :  { %846 = vmatmul.msk.f32.vlgmr.msra.gmra.mxu1 %vm229_vm8, %v1231_v19  ;;  %v227_v22 = vmul.f32 1.442695, %v224_v21  ;;  %v279_v28 = vmul.f32 1.442695, %v276_v27 }
 0x156   :  { %375 = vmatpush.bf16.msrb.mxu1 %v867_v41 }
 0x157   :  { %1023 = vpow2.f32 %v227_v22 }
 0x158   :  { %1025 = vpow2.f32 %v277_v37 }
 0x15a   :  { %376 = vmatpush.bf16.msrb.mxu1 %v855_v17 }
 0x15d   :  { %v1024_v23 = vpop.eup %1023 }
 0x15e   :  { %268 = vmatpush.msra.mxu2 %v1024_v23  ;;  %v1026_v42 = vpop.eup %1025  ;;  %389 = vmatpush.bf16.msra.mxu1 %v871_v55 }
 0x15f   :  { %847 = vmatmul.msk.f32.vlgmr.msra.gmra.mxu2 %vm229_vm8, %v1231_v19 }
 0x162   :  { %390 = vmatpush.bf16.msra.mxu1 %v859_v58 }
 0x1d2   :  { %v250_v25 = vpop.f32.mrf.mxu1 }
 0x1d3   :  { %v281_v26 = vadd.f32 %v1026_v42, %v250_v25 }
 0x1d5   :  { %1027 = vlog2.f32 %v281_v26 }
 0x1d6   :  { %1029 = vpow2.f32 %v279_v28 }
 0x1db   :  { %v1028_v29 = vpop.eup %1027 }
 0x1dc   :  { %v284_v30 = vmul.f32 0.6931472, %v1028_v29  ;;  %v1030_v46 = vpop.eup %1029 }
 0x1de   :  { %v287_v35 = vadd.f32 %v284_v30, %v273_v9  ;;  %v1280_v9 = vld [vmem:[%s1365_s4] sm:$0x7]  ;;  %s1126_s4 = smov 96  }
 0x1df   :  { %v315_v10 = vperm.slane %v1280_v9, 1  ;;  %v314_v14 = vperm.slane %v1280_v9, 0 }
 0x1e0   :  { %v289_v49 = vmin.f32 %v287_v35, 60.0 }
 0x1e2   :  { %v270_v47 = vpop.f32.mrf.mxu2  ;;  %v291_v50 = vmul.f32 1.442695, %v289_v49 }
 0x1e3   :  { %v282_v48 = vadd.f32 %v1030_v46, %v270_v47 }
 0x1e5   :  { %1031 = vlog2.f32 %v282_v48 }
 0x1e6   :  { %1033 = vpow2.f32 %v291_v50 }
 0x1eb   :  { %v1032_v54 = vpop.eup %1031 }
 0x1ec   :  { %v286_v33 = vmul.f32 0.6931472, %v1032_v54  ;;  %v1034_v61 = vpop.eup %1033 }
 0x1ed   :  { %v295_v63 = vmul.f32 0.5, %v1034_v61 }
 0x1ee   :  { %v288_v59 = vadd.f32 %v286_v33, %v274_v57 }
 0x1f0   :  { %v290_v60 = vmin.f32 %v288_v59, 60.0 }
 0x1f2   :  { %v293_v62 = vmul.f32 1.442695, %v290_v60 }
 0x1f4   :  { %1035 = vpow2.f32 %v293_v62 }
 0x1f5   :  { %1037 = vtanh.f32 %v295_v63 }
 0x1fa   :  { %v1036_v0 = vpop.eup %1035 }
 0x1fb   :  { %v296_v2 = vmul.f32 0.5, %v1036_v0  ;;  %v1038_v3 = vpop.eup %1037 }
 0x1fc   :  { %v299_v4 = vmul.f32 0.5, %v1038_v3 }
 0x1fd   :  { %1039 = vtanh.f32 %v296_v2 }
 0x1fe   :  { %v301_v1 = vadd.f32 0.5, %v299_v4 }
 0x203   :  { %v1040_v5 = vpop.eup %1039 }
 0x204   :  { %v300_v6 = vmul.f32 0.5, %v1040_v5 }
 0x206   :  { %v302_v7 = vadd.f32 0.5, %v300_v6 }
 0x208   :  { %v303_v8 = vpack.c.bf16 %v302_v7, %v301_v1 }
 0x20a   :  { %872 = vmatmul.msk.bf16.vlgmr.msrb.gmra.mxu3 %vm173_vm6, %v303_v8  ;;  %873 = vmatmul.msk.bf16.vlgmr.msrb.gmra.mxu1 %vm173_vm6, %v303_v8 }
 0x21a   :  { %874 = vmatmul.msk.bf16.vlgmr.msra.gmra.mxu1 %vm173_vm6, %v303_v8 }
 0x287   :  { %v378_v11 = vpop.f32.mrf.mxu1 }
 0x288   :  { %v379_v12 = vadd.f32 %v378_v11, %v315_v10 }
 0x28a   :  { %v398_v13 = vsub.f32 0.0, %v379_v12 }
 0x28c   :  { %v406_v15 = vand.u32 2147483647, %v398_v13  ;;  %v402_v49 = vmax.f32 %v398_v13, 0.0 }
 0x28d   :  { %v364_v16 = vpop.f32.mrf.mxu3 }
 0x28e   :  { %v410_v18 = vsub.f32 0.0, %v406_v15  ;;  %v365_v20 = vadd.f32 %v364_v16, %v314_v14 }
 0x28f   :  { %v380_v21 = vpop.f32.mrf.mxu1 }
 0x290   :  { %v415_v22 = vmul.f32 1.442695, %v410_v18  ;;  %v397_v23 = vsub.f32 0.0, %v365_v20  ;;  %v381_v24 = vadd.f32 %v380_v21, %v315_v10 }
 0x292   :  { %1041 = vpow2.f32 %v415_v22  ;;  %v405_v37 = vand.u32 2147483647, %v397_v23  ;;  %v400_v42 = vsub.f32 0.0, %v381_v24  ;;  %v401_v50 = vmax.f32 %v397_v23, 0.0 }
 0x294   :  { %v409_v25 = vsub.f32 0.0, %v405_v37  ;;  %v408_v26 = vand.u32 2147483647, %v400_v42  ;;  %v404_v59 = vmax.f32 %v400_v42, 0.0  ;;  %v316_v37 = vperm.slane %v1280_v9, 2 }
 0x295   :  { %v366_v27 = vpop.f32.mrf.mxu3 }
 0x296   :  { %v413_v28 = vmul.f32 1.442695, %v409_v25  ;;  %v412_v29 = vsub.f32 0.0, %v408_v26  ;;  %v367_v30 = vadd.f32 %v366_v27, %v314_v14 }
 0x297   :  { %v392_v24 = vpop.f32.mrf.mxu1 }
 0x298   :  { %v1042_v31 = vpop.eup %1041  ;;  %1043 = vpow2.f32 %v413_v28  ;;  %v419_v32 = vmul.f32 1.442695, %v412_v29  ;;  %v399_v34 = vsub.f32 0.0, %v367_v30  ;;  %v393_v42 = vadd.f32 %v392_v24, %v316_v37 }
 0x299   :  { %v422_v35 = vadd.f32 1.0, %v1042_v31 }
 0x29a   :  { %1045 = vpow2.f32 %v419_v32  ;;  %v407_v36 = vand.u32 2147483647, %v399_v34  ;;  %v403_v60 = vmax.f32 %v399_v34, 0.0  ;;  %v461_v25 = vmin.f32 %v393_v42, 0.0 }
 0x29b   :  { %1047 = vlog2.f32 %v422_v35  ;;  %vm473_vm9 = vcmp.ge.f32.partialorder %v393_v42, 0.0 }
 0x29c   :  { %v411_v38 = vsub.f32 0.0, %v407_v36  ;;  %v463_v27 = vmul.f32 1.442695, %v461_v25 }
 0x29e   :  { %v1044_v39 = vpop.eup %1043  ;;  %v417_v40 = vmul.f32 1.442695, %v411_v38  ;;  %v475_v38 = vmax.f32 %v393_v42, 0.0 }
 0x29f   :  { %v421_v41 = vadd.f32 1.0, %v1044_v39  ;;  %v394_v26 = vpop.f32.mrf.mxu1 }
 0x2a0   :  { %v1046_v43 = vpop.eup %1045  ;;  %1049 = vpow2.f32 %v417_v40  ;;  %v395_v28 = vadd.f32 %v394_v26, %v316_v37  ;;  %v477_v40 = vadd.f32 0.5, %v475_v38 }
 0x2a1   :  { %1051 = vlog2.f32 %v421_v41  ;;  %v424_v44 = vadd.f32 1.0, %v1046_v43  ;;  %v1048_v45 = vpop.eup %1047 }
 0x2a2   :  { %v428_v46 = vmul.f32 0.6931472, %v1048_v45  ;;  %v462_v29 = vmin.f32 %v395_v28, 0.0  ;;  %v476_v43 = vmax.f32 %v395_v28, 0.0  ;;  %vm474_vm10 = vcmp.ge.f32.partialorder %v395_v28, 0.0 }
 0x2a3   :  { %1053 = vlog2.f32 %v424_v44 }
 0x2a4   :  { %v434_v52 = vadd.f32 %v428_v46, %v402_v49  ;;  %v465_v30 = vmul.f32 1.442695, %v462_v29  ;;  %v478_v45 = vadd.f32 0.5, %v476_v43 }
 0x2a6   :  { %v1050_v17 = vpop.eup %1049 }
 0x2a7   :  { %v1052_v47 = vpop.eup %1051  ;;  %v423_v48 = vadd.f32 1.0, %v1050_v17 }
 0x2a8   :  { %v426_v51 = vmul.f32 0.6931472, %v1052_v47 }
 0x2a9   :  { %1055 = vlog2.f32 %v423_v48  ;;  %v1054_v54 = vpop.eup %1053 }
 0x2aa   :  { %v433_v53 = vadd.f32 %v426_v51, %v401_v50  ;;  %v432_v57 = vmul.f32 0.6931472, %v1054_v54 }
 0x2ac   :  { %v1284_v55 = vsub.f32 %v434_v52, %v433_v53  ;;  %v436_v62 = vadd.f32 %v432_v57, %v404_v59 }
 0x2ae   :  { %v441_v56 = vand.u32 2147483647, %v1284_v55  ;;  %v439_v11 = vmax.f32 %v1284_v55, 0.0 }
 0x2af   :  { %v1056_v33 = vpop.eup %1055 }
 0x2b0   :  { %v443_v58 = vsub.f32 0.0, %v441_v56  ;;  %v430_v61 = vmul.f32 0.6931472, %v1056_v33 }
 0x2b2   :  { %v435_v63 = vadd.f32 %v430_v61, %v403_v60  ;;  %v445_v0 = vmul.f32 1.442695, %v443_v58 }
 0x2b4   :  { %v1287_v2 = vsub.f32 %v436_v62, %v435_v63  ;;  %1057 = vpow2.f32 %v445_v0 }
 0x2b6   :  { %v442_v3 = vand.u32 2147483647, %v1287_v2  ;;  %v440_v18 = vmax.f32 %v1287_v2, 0.0 }
 0x2b8   :  { %v444_v4 = vsub.f32 0.0, %v442_v3 }
 0x2ba   :  { %v1058_v5 = vpop.eup %1057  ;;  %v447_v6 = vmul.f32 1.442695, %v444_v4 }
 0x2bb   :  { %v449_v1 = vadd.f32 1.0, %v1058_v5 }
 0x2bc   :  { %1059 = vpow2.f32 %v447_v6 }
 0x2bd   :  { %1061 = vlog2.f32 %v449_v1 }
 0x2c2   :  { %v1060_v7 = vpop.eup %1059 }
 0x2c3   :  { %v1062_v8 = vpop.eup %1061  ;;  %v450_v10 = vadd.f32 1.0, %v1060_v7 }
 0x2c4   :  { %v452_v12 = vmul.f32 0.6931472, %v1062_v8 }
 0x2c5   :  { %1063 = vlog2.f32 %v450_v10 }
 0x2c6   :  { %v455_v13 = vadd.f32 %v452_v12, %v439_v11  ;;  %1065 = vpow2.f32 %v463_v27 }
 0x2c7   :  { %1067 = vpow2.f32 %v465_v30 }
 0x2c8   :  { %v457_v14 = vsub.f32 0.0, %v455_v13  ;;  %v459_v15 = vsub.f32 %v1284_v55, %v455_v13 }
 0x2ca   :  { %879 = vmatmul.msk.f32.vlgmr.msra.gmra.mxu0 %vm173_vm6, %v457_v14 }
 0x2cb   :  { %v1064_v16 = vpop.eup %1063 }
 0x2cc   :  { %v454_v20 = vmul.f32 0.6931472, %v1064_v16  ;;  %v1066_v31 = vpop.eup %1065 }
 0x2cd   :  { %v467_v32 = vadd.f32 1.0, %v1066_v31  ;;  %v1068_v34 = vpop.eup %1067 }
 0x2ce   :  { %v456_v21 = vadd.f32 %v454_v20, %v440_v18  ;;  %v468_v35 = vadd.f32 1.0, %v1068_v34 }
 0x2cf   :  { %1069 = vrcp.f32 %v467_v32 }
 0x2d0   :  { %v458_v22 = vsub.f32 0.0, %v456_v21  ;;  %v460_v23 = vsub.f32 %v1287_v2, %v456_v21  ;;  %1071 = vrcp.f32 %v468_v35 }
 0x2d2   :  { %880 = vmatmul.msk.f32.gmra.mxu0 %vm173_vm6, %v458_v22 }
 0x2d5   :  { %v1070_v36 = vpop.eup %1069 }
 0x2d6   :  { %v471_v39 = vmul.f32 %v1070_v36, %v1066_v31  ;;  %v1072_v41 = vpop.eup %1071 }
 0x2d7   :  { %v472_v44 = vmul.f32 %v1072_v41, %v1068_v34 }
 0x2d8   :  { %v479_v9 = vsel %vm473_vm9, %v477_v40, %v471_v39 }
 0x2d9   :  { %1073 = vlog2.f32 %v479_v9  ;;  %v480_v17 = vsel %vm474_vm10, %v478_v45, %v472_v44 }
 0x2da   :  { %1075 = vlog2.f32 %v480_v17 }
 0x2df   :  { %v1074_v46 = vpop.eup %1073 }
 0x2e0   :  { %v482_v47 = vmul.f32 0.6931472, %v1074_v46  ;;  %v1076_v51 = vpop.eup %1075 }
 0x2e1   :  { %v484_v54 = vmul.f32 0.6931472, %v1076_v51 }
 0x2e2   :  { %v514_v48 = vadd.f32 %v482_v47, %v459_v15 }
 0x2e3   :  { %v515_v56 = vadd.f32 %v484_v54, %v460_v23  ;;  %v960_v54 = vld [vmem:[%s1366_s5 + $0x38] sm:$0xff] }
 0x2e4   :  { %793 = vmatpush.bf16.msrb.mxu2 %v960_v54 }
 0x347   :  { %v508_v49 = vpop.f32.mrf.mxu0 }
 0x348   :  { %v516_v50 = vsub.f32 %v514_v48, %v508_v49 }
 0x34a   :  { %v518_v52 = vsel %vm173_vm6, %v516_v50, -inf }
 0x34b   :  { %v519_v53 = vrot.slane %v518_v52, 4 }
 0x34d   :  { %v520_v55 = vmax.f32 %v518_v52, %v519_v53  ;;  %v968_v53 = vld [vmem:[%s1366_s5 + $0x78] sm:$0xff] }
 0x34e   :  { %806 = vmatpush.bf16.msrb.mxu0 %v968_v53 }
 0x34f   :  { %v521_v57 = vrot.slane %v520_v55, 2  ;;  %v511_v33 = vpop.f32.mrf.mxu0 }
 0x350   :  { %v517_v58 = vsub.f32 %v515_v56, %v511_v33  ;;  %v966_v56 = vld [vmem:[%s1366_s5 + $0x68] sm:$0xff] }
 0x351   :  { %v522_v59 = vmax.f32 %v520_v55, %v521_v57  ;;  %v967_v55 = vld [vmem:[%s1366_s5 + $0x70] sm:$0xff] }
 0x352   :  { %v525_v60 = vsel %vm173_vm6, %v517_v58, -inf  ;;  %807 = vmatpush.bf16.msrb.mxu0 %v967_v55  ;;  %v959_v57 = vld [vmem:[%s1366_s5 + $0x30] sm:$0xff] }
 0x353   :  { %v523_v61 = vrot.slane %v522_v59, 1  ;;  %v526_v62 = vrot.slane %v525_v60, 4  ;;  %794 = vmatpush.bf16.msrb.mxu2 %v959_v57 }
 0x355   :  { %v524_v63 = vmax.f32 %v522_v59, %v523_v61  ;;  %v527_v0 = vmax.f32 %v525_v60, %v526_v62  ;;  %v964_v59 = vld [vmem:[%s1366_s5 + $0x58] sm:$0xff]  ;;  %v957_v60 = vld [vmem:[%s1366_s5 + $0x20] sm:$0xff]  ;;  %v963_v61 = vld [vmem:[%s1366_s5 + $0x50] sm:$0xff] }
 0x356   :  { %808 = vmatpush.bf16.msrb.mxu0 %v966_v56  ;;  %v956_v62 = vld [vmem:[%s1366_s5 + $0x18] sm:$0xff] }
 0x357   :  { %v532_v2 = vmax.f32 %v524_v63, -0.6931472  ;;  %v528_v3 = vrot.slane %v527_v0, 2  ;;  %v962_v63 = vld [vmem:[%s1366_s5 + $0x48] sm:$0xff] }
 0x359   :  { %v534_v4 = vsub.f32 %v516_v50, %v532_v2  ;;  %v580_v5 = vadd.f32 %v532_v2, %v508_v49  ;;  %v529_v6 = vmax.f32 %v527_v0, %v528_v3  ;;  %v582_v15 = vsub.f32 -0.6931472, %v532_v2  ;;  %v955_v0 = vld [vmem:[%s1366_s5 + $0x10] sm:$0xff]  ;;  %v961_v2 = vld [vmem:[%s1366_s5 + $0x40] sm:$0xff]  ;;  %v954_v3 = vld [vmem:[%s1366_s5 + $0x8] sm:$0xff] }
 0x35b   :  { %v536_v1 = vmul.f32 1.442695, %v534_v4  ;;  %v530_v7 = vrot.slane %v529_v6, 1  ;;  %v584_v18 = vmul.f32 1.442695, %v582_v15  ;;  %v953_v4 = vld [vmem:[%s1366_s5] sm:$0xff] }
 0x35d   :  { %1077 = vpow2.f32 %v536_v1  ;;  %v531_v8 = vmax.f32 %v529_v6, %v530_v7 }
 0x35f   :  { %v533_v10 = vmax.f32 %v531_v8, -0.6931472 }
 0x361   :  { %v535_v11 = vsub.f32 %v517_v58, %v533_v10  ;;  %v583_v16 = vsub.f32 -0.6931472, %v533_v10  ;;  %v581_v28 = vadd.f32 %v533_v10, %v511_v33  ;;  %v965_v33 = vld [vmem:[%s1366_s5 + $0x60] sm:$0xff]  ;;  %v958_v58 = vld [vmem:[%s1366_s5 + $0x28] sm:$0xff] }
 0x362   :  { %809 = vmatpush.bf16.msrb.mxu0 %v965_v33  ;;  %795 = vmatpush.bf16.msrb.mxu2 %v958_v58 }
 0x363   :  { %v1078_v12 = vpop.eup %1077  ;;  %v538_v13 = vmul.f32 1.442695, %v535_v11  ;;  %v586_v20 = vmul.f32 1.442695, %v583_v16 }
 0x364   :  { %555 = vmatpush.msra.mxu3 %v1078_v12 }
 0x365   :  { %1079 = vpow2.f32 %v538_v13  ;;  %881 = vmatmul.msk.f32.vlgmr.msra.gmra.mxu3 %vm229_vm8, %v1231_v19 }
 0x366   :  { %1081 = vpow2.f32 %v584_v18  ;;  %810 = vmatpush.bf16.msrb.mxu0 %v964_v59  ;;  %796 = vmatpush.bf16.msrb.mxu2 %v957_v60 }
 0x367   :  { %1083 = vpow2.f32 %v586_v20 }
 0x36a   :  { %811 = vmatpush.bf16.msrb.mxu0 %v963_v61  ;;  %797 = vmatpush.bf16.msrb.mxu2 %v956_v62 }
 0x36b   :  { %v1080_v14 = vpop.eup %1079 }
 0x36c   :  { %575 = vmatpush.msrb.mxu1 %v1080_v14  ;;  %v1082_v21 = vpop.eup %1081 }
 0x36d   :  { %882 = vmatmul.msk.f32.vlgmr.msrb.gmra.mxu1 %vm229_vm8, %v1231_v19  ;;  %v1084_v24 = vpop.eup %1083 }
 0x36e   :  { %812 = vmatpush.bf16.msrb.mxu0 %v962_v63  ;;  %798 = vmatpush.bf16.msrb.mxu2 %v955_v0 }
 0x372   :  { %813 = vmatpush.bf16.msrb.mxu0 %v961_v2  ;;  %799 = vmatpush.bf16.msrb.mxu2 %v954_v3 }
 0x376   :  { %800 = vmatpush.bf16.msrb.mxu2 %v953_v4 }
 0x3e8   :  { %v557_v22 = vpop.f32.mrf.mxu3 }
 0x3e9   :  { %v588_v23 = vadd.f32 %v1082_v21, %v557_v22 }
 0x3ea   :  { %v577_v37 = vpop.f32.mrf.mxu1 }
 0x3eb   :  { %1085 = vlog2.f32 %v588_v23  ;;  %v589_v42 = vadd.f32 %v1084_v24, %v577_v37 }
 0x3ed   :  { %1087 = vlog2.f32 %v589_v42  ;;  %v984_v42 = vld [vmem:[%s1367_s6] ss:$0 sm:$0xff] }
 0x3f1   :  { %v1086_v25 = vpop.eup %1085 }
 0x3f2   :  { %v591_v26 = vmul.f32 0.6931472, %v1086_v25 }
 0x3f3   :  { %v1088_v27 = vpop.eup %1087 }
 0x3f4   :  { %v594_v29 = vadd.f32 %v591_v26, %v580_v5  ;;  %v593_v19 = vmul.f32 0.6931472, %v1088_v27 }
 0x3f6   :  { %v596_v30 = vmin.f32 %v594_v29, 60.0  ;;  %v595_v31 = vadd.f32 %v593_v19, %v581_v28 }
 0x3f8   :  { %v598_v32 = vmul.f32 1.442695, %v596_v30  ;;  %v597_v34 = vmin.f32 %v595_v31, 60.0 }
 0x3fa   :  { %1089 = vpow2.f32 %v598_v32  ;;  %v600_v35 = vmul.f32 1.442695, %v597_v34 }
 0x3fc   :  { %1091 = vpow2.f32 %v600_v35 }
 0x400   :  { %v1090_v36 = vpop.eup %1089 }
 0x401   :  { %v602_v38 = vmul.f32 0.5, %v1090_v36 }
 0x402   :  { %v1092_v39 = vpop.eup %1091 }
 0x403   :  { %1093 = vtanh.f32 %v602_v38  ;;  %v603_v40 = vmul.f32 0.5, %v1092_v39 }
 0x405   :  { %1095 = vtanh.f32 %v603_v40 }
 0x409   :  { %v1094_v9 = vpop.eup %1093 }
 0x40a   :  { %v606_v41 = vmul.f32 0.5, %v1094_v9 }
 0x40b   :  { %v1096_v43 = vpop.eup %1095 }
 0x40c   :  { %v608_v44 = vadd.f32 0.5, %v606_v41  ;;  %v607_v45 = vmul.f32 0.5, %v1096_v43 }
 0x40e   :  { %610 = vst.msk [vmem:[#allocation2] sm:$0xff] %vm173_vm6, %v608_v44  ;;  %v609_v17 = vadd.f32 0.5, %v607_v45 }
 0x410   :  { %611 = vst.msk [vmem:[#allocation2 + $0x8] sm:$0xff] %vm173_vm6, %v609_v17 }
 0x417   :  { %v626_v46 = vld [vmem:[#allocation2 + $0x7] ss:$8 sm:$0x3]  ;;  %v618_v47 = vld [vmem:[#allocation2 + $0x3] ss:$8 sm:$0x3] }
 0x418   :  { %648 = vrot.lane.b32.xlu0 %v626_v46, %s1126_s4  ;;  %636 = vrot.lane.b32.xlu2 %v618_v47, %s1126_s4  ;;  %v614_v48 = vld [vmem:[#allocation2 + $0x1] ss:$8 sm:$0x3]  ;;  %v622_v49 = vld [vmem:[#allocation2 + $0x5] ss:$8 sm:$0x3] }
 0x419   :  { %v979_v50 = vpack.i.bf16 %v622_v49, %v614_v48  ;;  %v624_v51 = vld [vmem:[#allocation2 + $0x6] ss:$8 sm:$0x3]  ;;  %v616_v52 = vld [vmem:[#allocation2 + $0x2] ss:$8 sm:$0x3] }
 0x41a   :  { %v620_v7 = vld [vmem:[#allocation2 + $0x4] ss:$8 sm:$0x3]  ;;  %v612_v16 = vld [vmem:[#allocation2] ss:$8 sm:$0x3] }
 0x41b   :  { %980 = vrot.lane.b32.xlu1 %v979_v50, %s1127_s8 }
 0x420   :  { %644 = vrot.lane.b32.xlu2 %v624_v51, %s1128_s0 }
 0x423   :  { %632 = vrot.lane.b32.xlu1 %v616_v52, %s1128_s0 }
 0x472   :  { %v637_v5 = vpop.permute.xlu2 %636 }
 0x47a   :  { %v645_v8 = vpop.permute.xlu2 %644 }
 0x48a   :  { %v649_v11 = vpop.permute.xlu0 %648 }
 0x48d   :  { %v981_v6 = vpop.permute.xlu1 %980 }
 0x48e   :  { %v983_v1 = vunpack.i.h.bf16 %v981_v6  ;;  %v982_v12 = vunpack.i.l.bf16 %v981_v6 }
 0x490   :  { %v656_v10 = vsel %vm173_vm6, %v620_v7, %v983_v1  ;;  %v651_v20 = vsel %vm173_vm6, %v612_v16, %v982_v12 }
 0x491   :  { %v657_v13 = vsel %vm652_vm11, %v656_v10, %v645_v8 }
 0x492   :  { %v658_v14 = vsel %vm654_vm12, %v657_v13, %v649_v11 }
 0x493   :  { %v660_v15 = vpack.c.bf16 %v658_v14, %v658_v14 }
 0x495   :  { %v633_v18 = vpop.permute.xlu1 %632  ;;  %814 = vmatmul.bf16.vlgmr.msrb.gmra.mxu0 %v660_v15 }
 0x496   :  { %v653_v21 = vsel %vm652_vm11, %v651_v20, %v633_v18 }
 0x497   :  { %v655_v22 = vsel %vm654_vm12, %v653_v21, %v637_v5 }
 0x498   :  { %v659_v23 = vpack.c.bf16 %v655_v22, %v655_v22 }
 0x49a   :  { %801 = vmatmul.bf16.vlgmr.msrb.gmra.mxu2 %v659_v23 }
 0x512   :  { %v815_v24 = vpop.f32.mrf.mxu0 }
 0x51a   :  { %v817_v37 = vpop.f32.mrf.mxu0 }
 0x51d   :  { %v802_v25 = vpop.f32.mrf.mxu2 }
 0x51e   :  { %v803_v26 = vadd.f32 %v984_v42, %v802_v25 }
 0x520   :  { %v816_v27 = vadd.f32 %v815_v24, %v803_v26 }
 0x522   :  { %819 = vst [vmem:[#allocation3] sm:$0x3] %v816_v27  }
 0x523   :  { %834 = dma.vmem_to_hbm [thread:$0]  %s827_s13, 32, %s829_s16, [#allocation4], %s1130_s17, %s1130_s17, %s1131_s18  }
 0x525   :  { %v804_v28 = vpop.f32.mrf.mxu2 }
 0x526   :  { %1121 = dma.done.wait [#allocation4], 32  }
 0x527   :  { %1122 = vsyncadd [#allocation4], 4294967264 }
 0x528   :  { %839 = vsyncpa [#allocation4], 1 }

</bundles_post_ra>
